<compile_context>
chip_gen: v7x
topology: tpu7x:2x2x1
jax: 0.10.0
libtpu: 0.0.40
codegen_flags: <defaults>
</compile_context>

<pallas_src>
import jax
import jax.numpy as jnp
from jax import lax
from jax.experimental import pallas as pl
from jax.experimental.pallas import tpu as pltpu

_H1 = 128   # hidden 1
_H2 = 64    # hidden 2


def _round_up(x, m):
    return (x + m - 1) // m * m


def _cf_kernel(r_ref, j_ref, w1_ref, w2_ref, w3_ref, b_ref, o_ref):
    # r_ref, j_ref : (TM, D)   bf16 batch tile of the two embeddings
    # w1_ref       : (2, D, 128) bf16; [0] = resume half, [1] = job half
    # w2_ref       : (128, 64) bf16
    # w3_ref       : (8, 64)   bf16; row 0 = w3.T, rows 1..7 zero padding
    # b_ref        : (1, 256)  f32;  [0:128]=b1, [128:192]=b2, [192]=b3
    # o_ref        : (1, TM)   f32 lane-dense output row (sigmoid scores)

    # Layer 1: Linear(2D -> 128) + ReLU.  concat == sum of two partial matmuls
    # against the split weight; leading-axis indexing of w1 is a zero-cost view.
    h1 = (
        jnp.dot(r_ref[...], w1_ref[0], preferred_element_type=jnp.float32)
        + jnp.dot(j_ref[...], w1_ref[1], preferred_element_type=jnp.float32)
        + b_ref[:, 0:_H1]
    )
    h1 = jnp.maximum(h1, 0.0).astype(jnp.bfloat16)

    # Layer 2: Linear(128 -> 64) + ReLU (bf16 operands, f32 accumulate)
    h2 = (
        jnp.dot(h1, w2_ref[...], preferred_element_type=jnp.float32)
        + b_ref[:, _H1:_H1 + _H2]
    )
    h2 = jnp.maximum(h2, 0.0).astype(jnp.bfloat16)

    # Layer 3: Linear(64 -> 1) + Sigmoid, lane-dense.  (8, 64) x (TM, 64)
    # contracted over the 64 axis (NT form) -> (8, TM): no h2.T materialized,
    # only row 0 carries the real weights.
    h3 = lax.dot_general(
        w3_ref[...], h2,
        dimension_numbers=(((1,), (1,)), ((), ())),
        preferred_element_type=jnp.float32,
    )
    o_ref[...] = jax.nn.sigmoid(h3[0:1, :] + b_ref[:, _H1 + _H2:_H1 + _H2 + 1])


def collaborative_filtering(resume_emb, job_emb, params, *, tm=8192,
                            min_grid_steps=2):
    """resume_emb, job_emb: (B, D) float arrays. Returns (B, 1) float32 scores.

    Streamed operands and weights are cast to bfloat16 (f32 accumulation),
    which introduces ~1e-2-relative rounding before the sigmoid — fine for a
    CTR-style score.
    """
    w1, b1, w2, b2, w3, b3 = params
    B, D = resume_emb.shape
    assert job_emb.shape == (B, D)

    cdt = jnp.bfloat16

    # Batch tile: multiple of 128 (lane-dense output block), capped at `tm`,
    # and sized so there are at least `min_grid_steps` grid steps (keeps both
    # v7x TensorCores busy via the "parallel" grid axis).
    TM = min(tm, _round_up(max(pl.cdiv(max(B, 1), min_grid_steps), 1), 128))
    n_steps = max(pl.cdiv(max(B, 1), TM), min_grid_steps)
    B_pad = TM * n_steps
    if B_pad != B:
        pad = ((0, B_pad - B), (0, 0))
        resume_emb = jnp.pad(resume_emb, pad)
        job_emb = jnp.pad(job_emb, pad)

    # One-time (tiny) operand prep, all cast to bf16 except the packed biases.
    r = resume_emb.astype(cdt)
    j = job_emb.astype(cdt)
    w1r = jnp.asarray(w1, jnp.float32).reshape(2, D, _H1).astype(cdt)
    w2c = jnp.asarray(w2, cdt)
    w3p = jnp.zeros((8, _H2), cdt).at[0, :].set(jnp.asarray(w3[:, 0], cdt))
    bias = (
        jnp.zeros((1, 256), jnp.float32)
        .at[:, 0:_H1].set(jnp.asarray(b1, jnp.float32))
        .at[:, _H1:_H1 + _H2].set(jnp.asarray(b2, jnp.float32))
        .at[:, _H1 + _H2:_H1 + _H2 + 1].set(jnp.asarray(b3, jnp.float32))
    )

    # Explicit scoped-VMEM budget (v5e default is only 16 MiB): two streamed
    # inputs x 2 buffers, resident weights x 2 buffers, f32+bf16 intermediates,
    # sublane-padded output x 2 buffers, plus headroom.  Capped at 48 MiB so it
    # also fits v7x's 64 MiB physical VMEM.
    es = jnp.dtype(cdt).itemsize
    bytes_inputs = 2 * 2 * TM * D * es
    bytes_weights = 2 * (2 * D * _H1 + _H1 * _H2 + 8 * _H2) * es + 2 * 256 * 4
    bytes_interm = TM * (_H1 * (4 + es) + _H2 * (4 + es)) + 8 * TM * 4
    bytes_out = 2 * 8 * TM * 4
    vmem_limit = bytes_inputs + bytes_weights + bytes_interm + bytes_out + (4 << 20)
    vmem_limit = int(min(max(vmem_limit, 16 << 20), 48 << 20))

    out = pl.pallas_call(
        _cf_kernel,
        out_shape=jax.ShapeDtypeStruct((1, B_pad), jnp.float32),
        grid=(n_steps,),
        in_specs=[
            pl.BlockSpec((TM, D), lambda i: (i, 0)),         # resume tile (bf16)
            pl.BlockSpec((TM, D), lambda i: (i, 0)),         # job tile (bf16)
            pl.BlockSpec((2, D, _H1), lambda i: (0, 0, 0)),  # w1 (resident)
            pl.BlockSpec((_H1, _H2), lambda i: (0, 0)),      # w2 (resident)
            pl.BlockSpec((8, _H2), lambda i: (0, 0)),        # w3 padded (resident)
            pl.BlockSpec((1, 256), lambda i: (0, 0)),        # packed biases (f32)
        ],
        out_specs=pl.BlockSpec((1, TM), lambda i: (0, i)),   # lane-dense scores
        compiler_params=pltpu.CompilerParams(
            dimension_semantics=("parallel",),
            vmem_limit_bytes=vmem_limit),
    )(r, j, w1r, w2c, w3p, bias)

    return out[0, :B].reshape(B, 1)


def init_params(key, embedding_dim):
    """Deterministic synthetic init (shapes match torch.nn.Linear in the module)."""
    k1, k2, k3, k4, k5, k6 = jax.random.split(key, 6)
    d2 = embedding_dim * 2
    scale = lambda fan_in: 1.0 / jnp.sqrt(fan_in)
    w1 = jax.random.uniform(k1, (d2, _H1), jnp.float32, -scale(d2), scale(d2))
    b1 = jax.random.uniform(k4, (1, _H1), jnp.float32, -scale(d2), scale(d2))
    w2 = jax.random.uniform(k2, (_H1, _H2), jnp.float32, -scale(_H1), scale(_H1))
    b2 = jax.random.uniform(k5, (1, _H2), jnp.float32, -scale(_H1), scale(_H1))
    w3 = jax.random.uniform(k3, (_H2, 1), jnp.float32, -scale(_H2), scale(_H2))
    b3 = jax.random.uniform(k6, (1, 1), jnp.float32, -scale(_H2), scale(_H2))
    return (w1, b1, w2, b2, w3, b3)


def _reference(resume_emb, job_emb, params):
    w1, b1, w2, b2, w3, b3 = params
    x = jnp.concatenate([resume_emb, job_emb], axis=1)
    h = jnp.maximum(x @ w1 + b1, 0.0)
    h = jnp.maximum(h @ w2 + b2, 0.0)
    return jax.nn.sigmoid(h @ w3 + b3)


if __name__ == "__main__":
    B, D = 8, 32
    key = jax.random.PRNGKey(0)
    kr, kj, kp = jax.random.split(key, 3)
    resume_emb = jax.random.normal(kr, (B, D), jnp.float32)
    job_emb = jax.random.normal(kj, (B, D), jnp.float32)
    params = init_params(kp, D)

    out = collaborative_filtering(resume_emb, job_emb, params)
    out = jax.block_until_ready(out)

    ref = _reference(resume_emb, job_emb, params)
    assert out.shape == (B, 1)
    # bf16 streaming path: looser tolerance than the pure-f32 reference.
    assert jnp.allclose(out, ref, atol=2e-2, rtol=2e-2), float(
        jnp.max(jnp.abs(out - ref)))
    print("KERNEL_OK")
</pallas_src>

<mosaic_0001>
module attributes {stable_mosaic.version = 11 : i64} {
  func.func @_cf_kernel(%arg0: i32, %arg1: memref<128x32xbf16, #tpu.memory_space<vmem>>, %arg2: memref<128x32xbf16, #tpu.memory_space<vmem>>, %arg3: memref<2x32x128xbf16, #tpu.memory_space<vmem>>, %arg4: memref<128x64xbf16, #tpu.memory_space<vmem>>, %arg5: memref<8x64xbf16, #tpu.memory_space<vmem>>, %arg6: memref<1x256xf32, #tpu.memory_space<vmem>>, %arg7: memref<1x128xf32, #tpu.memory_space<vmem>>) attributes {dimension_semantics = [#tpu.dimension_semantics<parallel>], iteration_bounds = array<i64: 2>, scalar_prefetch = 0 : i64, scratch_operands = 0 : i64, tpu.core_type = #tpu.core_type<tc>, window_params = [{transform_indices = @transform_0, window_bounds = array<i64: 128, 32>}, {transform_indices = @transform_1, window_bounds = array<i64: 128, 32>}, {pipeline_mode = #tpu.pipeline_mode<synchronous>, transform_indices = @transform_2, window_bounds = array<i64: 2, 32, 128>}, {pipeline_mode = #tpu.pipeline_mode<synchronous>, transform_indices = @transform_3, window_bounds = array<i64: 128, 64>}, {pipeline_mode = #tpu.pipeline_mode<synchronous>, transform_indices = @transform_4, window_bounds = array<i64: 8, 64>}, {pipeline_mode = #tpu.pipeline_mode<synchronous>, transform_indices = @transform_5, window_bounds = array<i64: 1, 256>}, {transform_indices = @transform_6, window_bounds = array<i64: 1, 128>}]} {
    %c0 = arith.constant 0 : index
    %c0_0 = arith.constant 0 : index
    %0 = vector.load %arg1[%c0, %c0_0] : memref<128x32xbf16, #tpu.memory_space<vmem>>, vector<128x32xbf16>
    %c0_1 = arith.constant 0 : index
    %c0_2 = arith.constant 0 : index
    %c0_3 = arith.constant 0 : index
    %1 = vector.load %arg3[%c0_1, %c0_2, %c0_3] : memref<2x32x128xbf16, #tpu.memory_space<vmem>>, vector<1x32x128xbf16>
    %2 = vector.shape_cast %1 : vector<1x32x128xbf16> to vector<32x128xbf16>
    %cst = arith.constant dense<0.000000e+00> : vector<128x128xf32>
    %3 = tpu.matmul %0, %2, %cst {dimension_numbers = #tpu.dot_dimension_numbers<[1], [0], [0], [1], [0, 0, 1, 1], [], []>} : vector<128x32xbf16>, vector<32x128xbf16>, vector<128x128xf32> -> vector<128x128xf32>
    %c0_4 = arith.constant 0 : index
    %c0_5 = arith.constant 0 : index
    %4 = vector.load %arg2[%c0_4, %c0_5] : memref<128x32xbf16, #tpu.memory_space<vmem>>, vector<128x32xbf16>
    %c1 = arith.constant 1 : index
    %c0_6 = arith.constant 0 : index
    %c0_7 = arith.constant 0 : index
    %5 = vector.load %arg3[%c1, %c0_6, %c0_7] : memref<2x32x128xbf16, #tpu.memory_space<vmem>>, vector<1x32x128xbf16>
    %6 = vector.shape_cast %5 : vector<1x32x128xbf16> to vector<32x128xbf16>
    %cst_8 = arith.constant dense<0.000000e+00> : vector<128x128xf32>
    %7 = tpu.matmul %4, %6, %cst_8 {dimension_numbers = #tpu.dot_dimension_numbers<[1], [0], [0], [1], [0, 0, 1, 1], [], []>} : vector<128x32xbf16>, vector<32x128xbf16>, vector<128x128xf32> -> vector<128x128xf32>
    %8 = arith.addf %3, %7 : vector<128x128xf32>
    %c0_9 = arith.constant 0 : index
    %c0_10 = arith.constant 0 : index
    %9 = vector.load %arg6[%c0_9, %c0_10] : memref<1x256xf32, #tpu.memory_space<vmem>>, vector<1x128xf32>
    %10 = vector.broadcast %9 : vector<1x128xf32> to vector<128x128xf32>
    %11 = arith.addf %8, %10 : vector<128x128xf32>
    %cst_11 = arith.constant 0.000000e+00 : f32
    %12 = vector.broadcast %cst_11 : f32 to vector<128x128xf32>
    %13 = arith.maximumf %11, %12 : vector<128x128xf32>
    %14 = arith.truncf %13 : vector<128x128xf32> to vector<128x128xbf16>
    %c0_12 = arith.constant 0 : index
    %c0_13 = arith.constant 0 : index
    %15 = vector.load %arg4[%c0_12, %c0_13] : memref<128x64xbf16, #tpu.memory_space<vmem>>, vector<128x64xbf16>
    %cst_14 = arith.constant dense<0.000000e+00> : vector<128x64xf32>
    %16 = tpu.matmul %14, %15, %cst_14 {dimension_numbers = #tpu.dot_dimension_numbers<[1], [0], [0], [1], [0, 0, 1, 1], [], []>} : vector<128x128xbf16>, vector<128x64xbf16>, vector<128x64xf32> -> vector<128x64xf32>
    %c0_15 = arith.constant 0 : index
    %c128 = arith.constant 128 : index
    %17 = vector.load %arg6[%c0_15, %c128] : memref<1x256xf32, #tpu.memory_space<vmem>>, vector<1x64xf32>
    %18 = vector.broadcast %17 : vector<1x64xf32> to vector<128x64xf32>
    %19 = arith.addf %16, %18 : vector<128x64xf32>
    %cst_16 = arith.constant 0.000000e+00 : f32
    %20 = vector.broadcast %cst_16 : f32 to vector<128x64xf32>
    %21 = arith.maximumf %19, %20 : vector<128x64xf32>
    %22 = arith.truncf %21 : vector<128x64xf32> to vector<128x64xbf16>
    %c0_17 = arith.constant 0 : index
    %c0_18 = arith.constant 0 : index
    %23 = vector.load %arg5[%c0_17, %c0_18] : memref<8x64xbf16, #tpu.memory_space<vmem>>, vector<8x64xbf16>
    %cst_19 = arith.constant dense<0.000000e+00> : vector<8x128xf32>
    %24 = tpu.matmul %23, %22, %cst_19 {dimension_numbers = #tpu.dot_dimension_numbers<[1], [1], [0], [0], [0, 0, 1, 0], [], []>} : vector<8x64xbf16>, vector<128x64xbf16>, vector<8x128xf32> -> vector<8x128xf32>
    %25 = vector.extract_strided_slice %24 {offsets = [0, 0], sizes = [1, 128], strides = [1, 1]} : vector<8x128xf32> to vector<1x128xf32>
    %c0_20 = arith.constant 0 : index
    %c192 = arith.constant 192 : index
    %26 = vector.load %arg6[%c0_20, %c192] : memref<1x256xf32, #tpu.memory_space<vmem>>, vector<1x1xf32>
    %27 = vector.broadcast %26 : vector<1x1xf32> to vector<1x128xf32>
    %28 = arith.addf %25, %27 : vector<1x128xf32>
    %29 = arith.negf %28 : vector<1x128xf32>
    %30 = math.exp %29 : vector<1x128xf32>
    %cst_21 = arith.constant 1.000000e+00 : f32
    %31 = vector.broadcast %cst_21 : f32 to vector<1x128xf32>
    %32 = arith.addf %31, %30 : vector<1x128xf32>
    %33 = arith.divf %31, %32 : vector<1x128xf32>
    %c0_22 = arith.constant 0 : index
    %c0_23 = arith.constant 0 : index
    %34 = vector.load %arg7[%c0_22, %c0_23] : memref<1x128xf32, #tpu.memory_space<vmem>>, vector<1x128xf32>
    tpu.vector_store %arg7[%c0_22, %c0_23], %33 {strides = array<i32>} : memref<1x128xf32, #tpu.memory_space<vmem>>, vector<1x128xf32>,
    return
  }
  func.func @transform_0(%arg0: i32) -> (i32, i32) {
    %c0_i32 = arith.constant 0 : i32
    %c0_i32_0 = arith.constant 0 : i32
    return %arg0, %c0_i32 : i32, i32
  }
  func.func @transform_1(%arg0: i32) -> (i32, i32) {
    %c0_i32 = arith.constant 0 : i32
    %c0_i32_0 = arith.constant 0 : i32
    return %arg0, %c0_i32 : i32, i32
  }
  func.func @transform_2(%arg0: i32) -> (i32, i32, i32) {
    %c0_i32 = arith.constant 0 : i32
    %c0_i32_0 = arith.constant 0 : i32
    %c0_i32_1 = arith.constant 0 : i32
    %c0_i32_2 = arith.constant 0 : i32
    return %c0_i32, %c0_i32_0, %c0_i32_1 : i32, i32, i32
  }
  func.func @transform_3(%arg0: i32) -> (i32, i32) {
    %c0_i32 = arith.constant 0 : i32
    %c0_i32_0 = arith.constant 0 : i32
    %c0_i32_1 = arith.constant 0 : i32
    return %c0_i32, %c0_i32_0 : i32, i32
  }
  func.func @transform_4(%arg0: i32) -> (i32, i32) {
    %c0_i32 = arith.constant 0 : i32
    %c0_i32_0 = arith.constant 0 : i32
    %c0_i32_1 = arith.constant 0 : i32
    return %c0_i32, %c0_i32_0 : i32, i32
  }
  func.func @transform_5(%arg0: i32) -> (i32, i32) {
    %c0_i32 = arith.constant 0 : i32
    %c0_i32_0 = arith.constant 0 : i32
    %c0_i32_1 = arith.constant 0 : i32
    return %c0_i32, %c0_i32_0 : i32, i32
  }
  func.func @transform_6(%arg0: i32) -> (i32, i32) {
    %c0_i32 = arith.constant 0 : i32
    %c0_i32_0 = arith.constant 0 : i32
    return %c0_i32, %arg0 : i32, i32
  }
}

</mosaic_0001>

<bundles_post_ra>
// kernel: tpu_custom_call.1
= control target key start
LH: loop header
LB: loop body
LE: loop exit
PB: predicated region body
PF: predicated region fallthrough
CT: control target
= control target key end

     0   :  { %11 = vsyncpa [#allocation3], 0  ;;  %s1667_s0 = inlined_call_operand.vmem [shape: bf16[256,32], index: 0, kind: input, shape index: {}]   ;;  %s1668_s1 = inlined_call_operand.vmem [shape: bf16[256,32], index: 1, kind: input, shape index: {}]   ;;  %s1669_s2 = inlined_call_operand.vmem [shape: bf16[2,32,128], index: 2, kind: input, shape index: {}]   ;;  %s1670_s3 = inlined_call_operand.vmem [shape: bf16[128,64], index: 3, kind: input, shape index: {}]   ;;  %s1671_s4 = inlined_call_operand.vmem [shape: bf16[8,64], index: 4, kind: input, shape index: {}]   ;;  %s1672_s5 = inlined_call_operand.vmem [shape: f32[1,256], index: 5, kind: input, shape index: {}]   ;;  %s1673_s6 = inlined_call_operand.hbm [shape: f32[1,256], index: 6, kind: output, shape index: {}]  }
   0x1   :  { %13 = vsyncpa [#allocation3 + $0x1], 0  ;;  %s1459_s21 = smov 0   ;;  %s1461_s22 = smov 0  }
   0x2   :  { %s1463_s23 = smov 0   ;;  %s1465_s24 = smov 0  }
   0x3 LB: > { %s1065_s25 = sadd.s32 4294967295, %s1418_s24   ;;  %s1066_s26 = sadd.s32 4294967294, %s1418_s24   ;;  %s1418_s24 = sphi %s1465_s24, %s1679_s24   ;;  %s1414_s23 = sphi %s1463_s23, %s1678_s23   ;;  %s1410_s22 = sphi %s1461_s22, %s1677_s22   ;;  %s1406_s21 = sphi %s1459_s21, %s1676_s21  }
   0x4   : > { %s1482_s27 = sadd.s32 1, %s1418_s24   ;;  %s162_s28 = sadd.s32 1, %s1414_s23 }
   0x5   : > { %s159_s29 = ssub.s32 %s1418_s24, %s1482_s27  ;;  %p172_p0 = scmp.ne.s32.totalorder %s1414_s23, %s1410_s22 }
   0x6   : > { %p160_p1 = scmp.eq.s32.totalorder %s159_s29, 0  ;;  %p173_p2 = scmp.eq.s32.totalorder %s1065_s25, 1 }
   0x7   : > { %p178_p3 = scmp.ne.s32.totalorder %s1410_s22, %s1406_s21  ;;  %p179_p4 = scmp.eq.s32.totalorder %s1066_s26, 1 }
   0x8   : > { %s1492_s30 = scalar_select %p160_p1, %s1414_s23, %s162_s28  }
   0x9   : > { %p1494_p5 = por %p173_p2, %p172_p0  ;;  %p1498_p6 = por %p179_p4, %p178_p3 }
   0xa   : > { %p1069_p7 = scmp.ge.s32.totalorder %s1418_s24, 1  ;;  %p227_p8 = scmp.lt.s32.totalorder %s1418_s24, 3 }
   0xc   : > { %p228_p9 = pnand %p1069_p7, %p227_p8 }
   0xd   : > { %v1324_v0 = vld [vmem:[%s1669_s2 + $0x10] sm:$0xff] (!%p228_p9)   ;;  %s1507_s11 = sshll.u32 (!%p228_p9), %s1065_s25, 4  ;;  %v1325_v1 = vld [vmem:[%s1669_s2 + $0x18] sm:$0xff] (!%p228_p9)   ;;  %v1328_v2 = vld [vmem:[%s1669_s2] sm:$0xff] (!%p228_p9)   ;;  %vm367_vm0 = vcmask (!%p228_p9), 261120   ;;  %vm1421_vm1 = vmmov (!%p228_p9), 0  }
   0xe   : > { %231 = sbr.rel (%p228_p9) target bundleno = 820 (0x334), region = 44  ;;  %p262_p10 = scmp.lt.s32.totalorder (!%p228_p9), %s1507_s11, 31  ;;  %1173 = vmatprep.subr.bf16.mxu0 (!%p228_p9), %v1324_v0  ;;  %v1344_v3 = vld [vmem:[%s1670_s3] sm:$0xff] (!%p228_p9)   ;;  %v1345_v4 = vld [vmem:[%s1670_s3 + $0x8] sm:$0xff] (!%p228_p9)   ;;  %v1346_v7 = vld [vmem:[%s1670_s3 + $0x10] sm:$0xff] (!%p228_p9)   ;;  %vm902_vm2 = vcmask (!%p228_p9), 523264  }
   0xf   : > { %1174 = vmatpush3.bf16.msra.mxu0 (!%p228_p9), %v1324_v0  ;;  %v1333_v5 = vld [vmem:[%s1669_s2 + $0x8] sm:$0xff] (!%p228_p9)   ;;  %1213 = vmatprep.subr.bf16.mxu1 (!%p228_p9), %v1344_v3  ;;  %v1347_v14 = vld [vmem:[%s1670_s3 + $0x18] sm:$0xff] (!%p228_p9)   ;;  %v1348_v15 = vld [vmem:[%s1670_s3 + $0x20] sm:$0xff] (!%p228_p9)   ;;  %s259_s18 = sand.u32 (!%p228_p9), 1, %s1410_s22   ;;  %s1625_s28 = scalar_lea.hbm (!%p228_p9), %s1673_s6, %s1507_s11 }
  0x10   : > { %1175 = vmatprep.subr.bf16.mxu0 (!%p228_p9), %v1325_v1  ;;  %1214 = vmatpush3.bf16.msra.mxu1 (!%p228_p9), %v1344_v3  ;;  %v1349_v16 = vld [vmem:[%s1670_s3 + $0x28] sm:$0xff] (!%p228_p9)   ;;  %v1350_v26 = vld [vmem:[%s1670_s3 + $0x30] sm:$0xff] (!%p228_p9)   ;;  %v1351_v27 = vld [vmem:[%s1670_s3 + $0x38] sm:$0xff] (!%p228_p9)   ;;  %s260_s20 = scalar_lea.vmem (!%p228_p9), [#allocation2], %s259_s18  ;;  %s1423_s10 = smov (!%p228_p9), [#allocation2]  }
  0x11   : > { %1215 = vmatprep.subr.bf16.mxu1 (!%p228_p9), %v1345_v4  ;;  %v1114_v28 = vld [vmem:[%s1672_s5] ss:$0 sm:$0xff] (!%p228_p9)  ;;  %s1360_s12 = sshll.u32 (!%p228_p9), %s1423_s10, 4  ;;  %s1361_s12 = int_to_ptr.vmem [resolvable:$false] %s1360_s12 }
  0x12   : > { %s1362_s13 = scalar_lea.vmem (!%p228_p9), %s1361_s12, 32 }
  0x13   : > { %1176 = vmatpush3.bf16.msra.mxu0 (!%p228_p9), %v1325_v1 }
  0x14   : > { %1193 = vmatprep.subr.bf16.mxu0 (!%p228_p9), %v1328_v2  ;;  %1216 = vmatpush3.bf16.msra.mxu1 (!%p228_p9), %v1345_v4 }
  0x15   : > { %s263_s14 = scalar_select %p262_p10, %s1507_s11, 31  ;;  %1217 = vmatprep.subr.bf16.mxu1 %v1346_v7 }
  0x17   : > { %s1071_s19 = sshll.u32 %s263_s14, 2 }
  0x18   : > { %s1526_s29 = scalar_lea.vmem %s1668_s1, %s1071_s19  ;;  %s1543_s16 = scalar_lea.vmem %s1667_s0, %s1071_s19  ;;  %1218 = vmatpush3.bf16.msra.mxu1 %v1346_v7 }
  0x19   : > { %v1326_v6 = vld [vmem:[%s1526_s29] sm:$0xff]   ;;  %v1327_v8 = vld [vmem:[%s1526_s29 + $0x8] sm:$0xff]   ;;  %v1329_v9 = vld [vmem:[%s1526_s29 + $0x10] sm:$0xff]   ;;  %1219 = vmatprep.subr.bf16.mxu1 %v1347_v14  ;;  %s999_s19 = sshll.u32 %s260_s20, 4  ;;  %s1627_s19 = int_to_ptr.vmem [resolvable:$true] %s999_s19 }
  0x1a   : > { %1177 = vmatprep.mubr.msk.bf16.mxu0 %vm367_vm0, %v1326_v6  ;;  %v1330_v10 = vld [vmem:[%s1526_s29 + $0x18] sm:$0xff]   ;;  %v1331_v11 = vld [vmem:[%s1526_s29 + $0x20] sm:$0xff]   ;;  %v1332_v12 = vld [vmem:[%s1526_s29 + $0x28] sm:$0xff]   ;;  %s1356_s9 = scalar_lea.vmem %s1627_s19, 16  ;;  %p1363_p0 = scmp.lt.s32.totalorder %s1627_s19, %s1361_s12 }
  0x1b   : > { %1178 = vmatmul.mubr.msk.bf16.vlgmr.msra.gmra.mrb[0].mxu0 %vm367_vm0, %v1327_v8  ;;  %v1334_v13 = vld [vmem:[%s1526_s29 + $0x30] sm:$0xff]   ;;  %v1335_v17 = vld [vmem:[%s1526_s29 + $0x38] sm:$0xff]   ;;  %v1336_v18 = vld [vmem:[%s1543_s16] sm:$0xff]   ;;  %s987_s29 = scalar_lea.sflag [#allocation3], %s259_s18  ;;  %p1357_p11 = scmp.ne.s32.totalorder %s1627_s19, %s1356_s9 }
  0x1c   : > { %1194 = vmatpush3.bf16.msra.mxu0 %v1328_v2  ;;  %1181 = vmatprep.mubr.msk.bf16.mxu0 %vm367_vm0, %v1329_v9  ;;  %v1337_v19 = vld [vmem:[%s1543_s16 + $0x8] sm:$0xff]   ;;  %v1338_v20 = vld [vmem:[%s1543_s16 + $0x10] sm:$0xff]   ;;  %v1339_v21 = vld [vmem:[%s1543_s16 + $0x18] sm:$0xff]   ;;  %p1364_p1 = scmp.lt.s32.totalorder %s1362_s13, %s1356_s9 }
  0x1d   : > { %1195 = vmatprep.subr.bf16.mxu0 %v1333_v5  ;;  %1220 = vmatpush3.bf16.msra.mxu1 %v1347_v14  ;;  %v1340_v22 = vld [vmem:[%s1543_s16 + $0x20] sm:$0xff]   ;;  %v1341_v23 = vld [vmem:[%s1543_s16 + $0x28] sm:$0xff]   ;;  %v1342_v24 = vld [vmem:[%s1543_s16 + $0x30] sm:$0xff]   ;;  %p1358_p12 = pnand %p1357_p11, %p1494_p5 }
  0x1e   : > { %1221 = vmatprep.subr.bf16.mxu1 %v1348_v15  ;;  %v1343_v25 = vld [vmem:[%s1543_s16 + $0x38] sm:$0xff]   ;;  %p1365_p2 = por %p1364_p1, %p1363_p0 }
  0x1f   : > { %p1359_p13 = pneg %p1358_p12 }
  0x20   : > { %1196 = vmatpush3.bf16.msra.mxu0 %v1333_v5 }
  0x21   : > { %1222 = vmatpush3.bf16.msra.mxu1 %v1348_v15  ;;  %p1366_p3 = pnand %p1365_p2, %p1359_p13 }
  0x22   : > { %1223 = vmatprep.subr.bf16.mxu1 %v1349_v16 }
  0x23   : > { %1182 = vmatmul.mubr.msk.bf16.gmra.mrb[4].mxu0 %vm367_vm0, %v1330_v10 }
  0x24   : > { %1185 = vmatprep.mubr.msk.bf16.mxu0 %vm367_vm0, %v1331_v11 }
  0x25   : > { %1224 = vmatpush3.bf16.msra.mxu1 %v1349_v16 }
  0x26   : > { %1225 = vmatprep.subr.bf16.mxu1 %v1350_v26 }
  0x29   : > { %1226 = vmatpush3.bf16.msra.mxu1 %v1350_v26 }
  0x2a   : > { %1227 = vmatprep.subr.bf16.mxu1 %v1351_v27 }
  0x2b   : > { %1186 = vmatmul.mubr.msk.bf16.gmra.mrb[8].mxu0 %vm367_vm0, %v1332_v12 }
  0x2c   : > { %1189 = vmatprep.mubr.msk.bf16.mxu0 %vm367_vm0, %v1334_v13 }
  0x2d   : > { %1228 = vmatpush3.bf16.msra.mxu1 %v1351_v27 }
  0x33   : > { %1190 = vmatmul.mubr.msk.bf16.gmra.mrb[12].mxu0 %vm367_vm0, %v1335_v17 }
  0x34   : > { %1197 = vmatprep.mubr.msk.bf16.mxu0 %vm367_vm0, %v1336_v18 }
  0x3b   : > { %1198 = vmatmul.mubr.msk.bf16.vlgmr.msra.gmra.mrb[0].mxu0 %vm367_vm0, %v1337_v19 }
  0x3c   : > { %1201 = vmatprep.mubr.msk.bf16.mxu0 %vm367_vm0, %v1338_v20 }
  0x43   : > { %1202 = vmatmul.mubr.msk.bf16.gmra.mrb[4].mxu0 %vm367_vm0, %v1339_v21  ;;  %v1420_v21 = vmov 0.0  }
  0x44   : > { %1205 = vmatprep.mubr.msk.bf16.mxu0 %vm367_vm0, %v1340_v22  ;;  %1245 = vmatprep.subr.bf16.mxu1 %v1420_v21  ;;  %v725_v22 = vld [vmem:[%s1672_s5 + $0x1] sm:$0x1] }
  0x4b   : > { %1206 = vmatmul.mubr.msk.bf16.gmra.mrb[8].mxu0 %vm367_vm0, %v1341_v23  ;;  %v1422_v23 = vmov 64  }
  0x4c   : > { %1209 = vmatprep.mubr.msk.bf16.mxu0 %vm367_vm0, %v1342_v24  ;;  %1323 = vset.pattern.permute.xlu0 %v1422_v23  ;;  %v727_v24 = vlaneseq }
  0x4d   : > { %971 = vperm.xlu0 %1323, %v725_v22  }
  0x53   : > { %1210 = vmatmul.mubr.msk.bf16.gmra.mrb[12].mxu0 %vm367_vm0, %v1343_v25  ;;  %v1594_v25 = vshrl.u32 %v727_v24, 7 }
  0x55   : > { %v729_v26 = vsub.s32 0, %v1594_v25 }
  0x57   : > { %v730_v27 = vrot.slane %v725_v22, %v729_v26 }
 0x10e   : > { %v1199_v29 = vpop.f32.mrb[0].mxu0 }
 0x10f   : > { %v671_v30 = vadd.f32 %v1199_v29, %v1114_v28  ;;  %v599_v31 = vpop.f32.mrb[1].mxu0 }
 0x110   : > { %v669_v32 = vadd.f32 %v1114_v28, %v599_v31  ;;  %v1200_v33 = vpop.f32.mrb[2].mxu0 }
 0x111   : > { %v672_v34 = vadd.f32 %v1200_v33, %v1114_v28  ;;  %v602_v35 = vpop.f32.mrb[3].mxu0  ;;  %v687_v37 = vmax.f32 %v671_v30, 0.0 }
 0x112   : > { %v670_v36 = vadd.f32 %v1114_v28, %v602_v35  ;;  %v685_v39 = vmax.f32 %v669_v32, 0.0 }
 0x113   : > { %v688_v38 = vmax.f32 %v672_v34, 0.0 }
 0x114   : > { %v686_v40 = vmax.f32 %v670_v36, 0.0 }
 0x115   : > { %v702_v41 = vpack.c.bf16 %v688_v38, %v687_v37 }
 0x116   : > { %v1203_v42 = vpop.f32.mrb[4].mxu0  ;;  %v701_v43 = vpack.c.bf16 %v686_v40, %v685_v39 }
 0x117   : > { %v675_v44 = vadd.f32 %v1203_v42, %v1114_v28  ;;  %v615_v45 = vpop.f32.mrb[5].mxu0 }
 0x118   : > { %v673_v46 = vadd.f32 %v1114_v28, %v615_v45  ;;  %v1204_v47 = vpop.f32.mrb[6].mxu0  ;;  %1229 = vmatprep.mubr.bf16.mxu1 %v701_v43 }
 0x119   : > { %v676_v48 = vadd.f32 %v1204_v47, %v1114_v28  ;;  %v618_v49 = vpop.f32.mrb[7].mxu0  ;;  %1230 = vmatmul.mubr.bf16.vlgmr.msra.gmra.mrb[0].mxu1 %v702_v41  ;;  %v691_v51 = vmax.f32 %v675_v44, 0.0 }
 0x11a   : > { %v674_v50 = vadd.f32 %v1114_v28, %v618_v49  ;;  %v689_v53 = vmax.f32 %v673_v46, 0.0 }
 0x11b   : > { %v692_v52 = vmax.f32 %v676_v48, 0.0 }
 0x11c   : > { %v690_v54 = vmax.f32 %v674_v50, 0.0 }
 0x11d   : > { %v704_v55 = vpack.c.bf16 %v692_v52, %v691_v51 }
 0x11e   : > { %v703_v56 = vpack.c.bf16 %v690_v54, %v689_v53  ;;  %v1207_v57 = vpop.f32.mrb[8].mxu0 }
 0x11f   : > { %v679_v58 = vadd.f32 %v1207_v57, %v1114_v28  ;;  %v631_v59 = vpop.f32.mrb[9].mxu0 }
 0x120   : > { %v677_v60 = vadd.f32 %v1114_v28, %v631_v59  ;;  %v1208_v61 = vpop.f32.mrb[10].mxu0  ;;  %1233 = vmatprep.mubr.bf16.mxu1 %v703_v56 }
 0x121   : > { %v680_v62 = vadd.f32 %v1208_v61, %v1114_v28  ;;  %v634_v63 = vpop.f32.mrb[11].mxu0  ;;  %1234 = vmatmul.mubr.bf16.gmra.mrb[4].mxu1 %v704_v55  ;;  %v695_v1 = vmax.f32 %v679_v58, 0.0 }
 0x122   : > { %v678_v0 = vadd.f32 %v1114_v28, %v634_v63  ;;  %v693_v3 = vmax.f32 %v677_v60, 0.0 }
 0x123   : > { %v696_v2 = vmax.f32 %v680_v62, 0.0 }
 0x124   : > { %v694_v4 = vmax.f32 %v678_v0, 0.0 }
 0x125   : > { %v706_v5 = vpack.c.bf16 %v696_v2, %v695_v1 }
 0x126   : > { %v705_v6 = vpack.c.bf16 %v694_v4, %v693_v3  ;;  %v1211_v7 = vpop.f32.mrb[12].mxu0 }
 0x127   : > { %v683_v8 = vadd.f32 %v1211_v7, %v1114_v28  ;;  %v647_v9 = vpop.f32.mrb[13].mxu0 }
 0x128   : > { %v681_v10 = vadd.f32 %v1114_v28, %v647_v9  ;;  %v1212_v11 = vpop.f32.mrb[14].mxu0  ;;  %1237 = vmatprep.mubr.bf16.mxu1 %v705_v6 }
 0x129   : > { %v684_v12 = vadd.f32 %v1212_v11, %v1114_v28  ;;  %v650_v13 = vpop.f32.mrb[15].mxu0  ;;  %1238 = vmatmul.mubr.bf16.gmra.mrb[8].mxu1 %v706_v5  ;;  %v699_v15 = vmax.f32 %v683_v8, 0.0 }
 0x12a   : > { %v682_v14 = vadd.f32 %v1114_v28, %v650_v13  ;;  %v697_v17 = vmax.f32 %v681_v10, 0.0 }
 0x12b   : > { %v700_v16 = vmax.f32 %v684_v12, 0.0 }
 0x12c   : > { %v698_v18 = vmax.f32 %v682_v14, 0.0 }
 0x12d   : > { %v708_v19 = vpack.c.bf16 %v700_v16, %v699_v15 }
 0x12e   : > { %v707_v20 = vpack.c.bf16 %v698_v18, %v697_v17 }
 0x130   : > { %1241 = vmatprep.mubr.bf16.mxu1 %v707_v20 }
 0x131   : > { %1242 = vmatmul.mubr.bf16.gmra.mrb[12].mxu1 %v708_v19 }
 0x132   : > { %1261 = vmatprep.mubr.msk.bf16.mxu1 %vm1421_vm1, %v1420_v21 }
 0x1ec   : > { %v1231_v28 = vpop.f32.mrb[0].mxu1 }
 0x1ed   : > { %v823_v29 = vadd.f32 %v1231_v28, %v730_v27  ;;  %v814_v30 = vpop.f32.mrb[1].mxu1 }
 0x1ee   : > { %v815_v31 = vadd.f32 %v814_v30, %v730_v27  ;;  %v1232_v32 = vpop.f32.mrb[2].mxu1 }
 0x1ef   : > { %v826_v33 = vadd.f32 %v1232_v32, %v730_v27  ;;  %v817_v34 = vpop.f32.mrb[3].mxu1  ;;  %v879_v36 = vmax.f32 %v823_v29, 0.0  ;;  %v972_v32 = vpop.permute.xlu0 %971 }
 0x1f0   : > { %v818_v35 = vadd.f32 %v817_v34, %v730_v27  ;;  %v877_v38 = vmax.f32 %v815_v31, 0.0  ;;  %v901_v31 = vld [vmem:[%s1671_s4] sm:$0xf] }
 0x1f1   : > { %v880_v37 = vmax.f32 %v826_v33, 0.0  ;;  %v977_v33 = vrot.slane %v972_v32, %v729_v26 }
 0x1f2   : > { %v878_v39 = vmax.f32 %v818_v35, 0.0 }
 0x1f3   : > { %v894_v40 = vpack.c.bf16 %v880_v37, %v879_v36 }
 0x1f4   : > { %v893_v41 = vpack.c.bf16 %v878_v39, %v877_v38  ;;  %v1235_v42 = vpop.f32.mrb[4].mxu1 }
 0x1f5   : > { %v839_v43 = vadd.f32 %v1235_v42, %v730_v27  ;;  %v830_v44 = vpop.f32.mrb[5].mxu1  ;;  %v910_v62 = vsel %vm902_vm2, %v894_v40, 0 }
 0x1f6   : > { %v831_v45 = vadd.f32 %v830_v44, %v730_v27  ;;  %v1236_v46 = vpop.f32.mrb[6].mxu1  ;;  %v907_v47 = vsel %vm902_vm2, %v893_v41, 0 }
 0x1f7   : > { %v842_v48 = vadd.f32 %v1236_v46, %v730_v27  ;;  %v833_v49 = vpop.f32.mrb[7].mxu1  ;;  %1246 = vmatpush3.bf16.xpose.msra.mxu1 %v907_v47  ;;  %v883_v51 = vmax.f32 %v839_v43, 0.0 }
 0x1f8   : > { %v834_v50 = vadd.f32 %v833_v49, %v730_v27  ;;  %1247 = vmatprep.subr.bf16.mxu1 %v1420_v21  ;;  %v881_v53 = vmax.f32 %v831_v45, 0.0 }
 0x1f9   : > { %v884_v52 = vmax.f32 %v842_v48, 0.0 }
 0x1fa   : > { %v882_v54 = vmax.f32 %v834_v50, 0.0 }
 0x1fb   : > { %v896_v55 = vpack.c.bf16 %v884_v52, %v883_v51 }
 0x1fc   : > { %v895_v56 = vpack.c.bf16 %v882_v54, %v881_v53  ;;  %v1239_v57 = vpop.f32.mrb[8].mxu1 }
 0x1fd   : > { %v855_v58 = vadd.f32 %v1239_v57, %v730_v27  ;;  %v846_v59 = vpop.f32.mrb[9].mxu1  ;;  %v916_v24 = vsel %vm902_vm2, %v896_v55, 0 }
 0x1fe   : > { %v847_v60 = vadd.f32 %v846_v59, %v730_v27  ;;  %v1240_v61 = vpop.f32.mrb[10].mxu1  ;;  %v913_v13 = vsel %vm902_vm2, %v895_v56, 0 }
 0x1ff   : > { %v858_v63 = vadd.f32 %v1240_v61, %v730_v27  ;;  %v849_v0 = vpop.f32.mrb[11].mxu1  ;;  %1248 = vmatpush3.bf16.xpose.msra.mxu1 %v910_v62  ;;  %v887_v2 = vmax.f32 %v855_v58, 0.0 }
 0x200   : > { %v850_v1 = vadd.f32 %v849_v0, %v730_v27  ;;  %1249 = vmatprep.subr.bf16.mxu1 %v1420_v21  ;;  %v885_v4 = vmax.f32 %v847_v60, 0.0 }
 0x201   : > { %v888_v3 = vmax.f32 %v858_v63, 0.0 }
 0x202   : > { %v886_v5 = vmax.f32 %v850_v1, 0.0 }
 0x203   : > { %v898_v6 = vpack.c.bf16 %v888_v3, %v887_v2 }
 0x204   : > { %v897_v7 = vpack.c.bf16 %v886_v5, %v885_v4  ;;  %v1243_v8 = vpop.f32.mrb[12].mxu1 }
 0x205   : > { %v871_v9 = vadd.f32 %v1243_v8, %v730_v27  ;;  %v862_v10 = vpop.f32.mrb[13].mxu1 }
 0x206   : > { %v863_v11 = vadd.f32 %v862_v10, %v730_v27  ;;  %v1244_v12 = vpop.f32.mrb[14].mxu1  ;;  %v919_v28 = vsel %vm902_vm2, %v897_v7, 0 }
 0x207   : > { %v874_v14 = vadd.f32 %v1244_v12, %v730_v27  ;;  %v865_v15 = vpop.f32.mrb[15].mxu1  ;;  %1250 = vmatpush3.bf16.xpose.msra.mxu1 %v913_v13  ;;  %v891_v17 = vmax.f32 %v871_v9, 0.0 }
 0x208   : > { %v866_v16 = vadd.f32 %v865_v15, %v730_v27  ;;  %1251 = vmatprep.subr.bf16.mxu1 %v1420_v21  ;;  %v889_v19 = vmax.f32 %v863_v11, 0.0  ;;  %v922_v27 = vsel %vm902_vm2, %v898_v6, 0 }
 0x209   : > { %v892_v18 = vmax.f32 %v874_v14, 0.0 }
 0x20a   : > { %v890_v20 = vmax.f32 %v866_v16, 0.0 }
 0x20b   : > { %v900_v22 = vpack.c.bf16 %v892_v18, %v891_v17 }
 0x20c   : > { %v899_v23 = vpack.c.bf16 %v890_v20, %v889_v19 }
 0x20d   : > { %v928_v30 = vsel %vm902_vm2, %v900_v22, 0 }
 0x20e   : > { %v925_v29 = vsel %vm902_vm2, %v899_v23, 0 }
 0x20f   : > { %1252 = vmatpush3.bf16.xpose.msra.mxu1 %v916_v24 }
 0x210   : > { %1253 = vmatprep.subr.bf16.mxu1 %v1420_v21 }
 0x217   : > { %1254 = vmatpush3.bf16.xpose.msra.mxu1 %v919_v28 }
 0x218   : > { %1255 = vmatprep.subr.bf16.mxu1 %v1420_v21 }
 0x21f   : > { %1256 = vmatpush3.bf16.xpose.msra.mxu1 %v922_v27 }
 0x220   : > { %1257 = vmatprep.subr.bf16.mxu1 %v1420_v21 }
 0x227   : > { %1258 = vmatpush3.bf16.xpose.msra.mxu1 %v925_v29 }
 0x228   : > { %1259 = vmatprep.subr.bf16.mxu1 %v1420_v21 }
 0x22f   : > { %1260 = vmatpush3.bf16.xpose.msra.mxu1 %v928_v30 }
 0x236   : > { %1262 = vmatmul.mubr.msk.bf16.vlgmr.msra.gmra.mrb[16].mxu1 %vm902_vm2, %v901_v31 }
 0x309   : > { %v964_v34 = vpop.f32.mrb[16].mxu1 }
 0x30a   : > { %v978_v35 = vadd.f32 %v977_v33, %v964_v34  ;;  %v1263_v36 = vpop.f32.mrb[17].mxu1 }
 0x30b   : > { %v967_v37 = vpop.f32.mrb[18].mxu1 }
 0x30c   : > { %v1124_v21 = vmul.f32 -1.442695, %v978_v35  ;;  %v1264_v38 = vpop.f32.mrb[19].mxu1 }
 0x30e   : > { %1352 = vpow2.f32 %v1124_v21 }
 0x318   : > { %v1353_v39 = vpop.eup %1352 }
 0x319   : > { %v982_v40 = vadd.f32 1.0, %v1353_v39 }
 0x31b   : > { %1354 = vrcp.f32 %v982_v40 }
 0x325   : > { %v1355_v25 = vpop.eup %1354 }
 0x326   : > { %985 = vst [vmem:[%s260_s20] sm:$0x1] %v1355_v25 }
 0x327   : > { %1369 = shalt.err (!%p1366_p3)
}
 0x328   : > { %s1370_s11 = scalar_lea.hbm %s1625_s28, 16  ;;  %s1374_s16 = scalar_lea.hbm %s1673_s6, 32 }
 0x329   : > { %p1371_p4 = scmp.ne.s32.totalorder %s1625_s28, %s1370_s11  ;;  %p1375_p9 = scmp.lt.u32.totalorder %s1625_s28, %s1673_s6 }
 0x32a   : > { %p1376_p10 = scmp.lt.u32.totalorder %s1374_s16, %s1370_s11  ;;  %p1378_p12 = scmp.lt.u32.totalorder %s1370_s11, %s1625_s28 }
 0x32b   : > { %p1372_p7 = pnand %p1371_p4, %p1494_p5 }
 0x32c   : > { %p1377_p11 = por %p1376_p10, %p1375_p9 }
 0x32d   : > { %p1373_p8 = pneg %p1372_p7 }
 0x32e   : > { %p1379_p13 = por %p1378_p12, %p1377_p11 }
 0x330   : > { %p1380_p0 = pnand %p1379_p13, %p1373_p8 }
 0x332   : > { %1383 = shalt.err (!%p1380_p0)
}
 0x333   : > { %1281 = dma.vmem_to_hbm [thread:$0]  (%p1494_p5), %s1627_s19, 16, %s1625_s28, %s987_s29  }
 0x334 PF: > { %p1287_p1 = scmp.ge.s32.totalorder %s1418_s24, 2  ;;  %s1011_s20 = sand.u32 1, %s1406_s21  }
 0x335   : > { %s1012_s25 = scalar_lea.sflag [#allocation3], %s1011_s20 }
 0x336   : > { %p1284_p2 = pnand %p1287_p1, %p1498_p6 }
 0x338   : > { %1401 = dma.done.wait (!%p1284_p2), %s1012_s25, 16  }
 0x339   : > { %1403 = vsyncadd (!%p1284_p2), %s1012_s25, 4294967280  ;;  %p16_p3 = scmp.ge.s32.totalorder %s1482_s27, 4   ;;  %s1676_s21 = smov %s1410_s22 }
 0x33a   : > { %s1677_s22 = smov %s1414_s23  ;;  %s1678_s23 = smov %s1492_s30 }
 0x33b   : > { %s1679_s24 = smov %s1482_s27  ;;  %18 = sbr.rel (!%p16_p3) target bundleno = 3 (0x3), region = 83 }
 0x342   :  { %1016 = vsyncpa [#allocation3], 1 }
 0x343   :  { %1018 = vsyncpa [#allocation3 + $0x1], 1 }

</bundles_post_ra>
